<compile_context>
chip_gen: v7x
topology: tpu7x:2x2x1
jax: 0.10.0
libtpu: 0.0.40
codegen_flags: <defaults>
</compile_context>

<pallas_src>
import functools

import jax
import jax.numpy as jnp
from jax.experimental import pallas as pl
from jax.experimental.pallas import tpu as pltpu


def _bce_rowsum_kernel(p_ref, t_ref, o_ref, *, lane_w, n_lane_blocks,
                       n_red_tiles, rem, need_mask):
    """Accumulate per-row (row = one (batch, class) pair) lane-partial BCE sums.

    p_ref, t_ref: (tile_r, tile_n) prediction / target tiles (native dtype).
    o_ref:        (tile_r, lane_w) running per-row lane-partial sums (f32).
    """
    j = pl.program_id(1)  # position along the reduction (N) axis

    @pl.when(j == 0)
    def _init():
        o_ref[...] = jnp.zeros_like(o_ref)

    rows = o_ref.shape[0]

    def bce_chunk(k):
        # One aligned 128-lane chunk, loaded and processed on the fly so
        # intermediates never exceed a few (tile_r, 128) f32 temporaries.
        p = p_ref[:, k * lane_w:(k + 1) * lane_w].astype(jnp.float32)
        t = t_ref[:, k * lane_w:(k + 1) * lane_w].astype(jnp.float32)
        # PyTorch F.binary_cross_entropy clamps each log term at -100.
        log_p = jnp.maximum(jnp.log(p), -100.0)
        log_1mp = jnp.maximum(jnp.log(1.0 - p), -100.0)
        # -(t*log(p) + (1-t)*log(1-p)) refactored to a single multiply
        # (no f32 FMA on the VPU, so every vmul is a real VALU slot).
        return -(log_1mp + t * (log_p - log_1mp))

    def accumulate_full():
        part = bce_chunk(0)
        for k in range(1, n_lane_blocks):
            part = part + bce_chunk(k)
        o_ref[...] += part

    if not need_mask:
        accumulate_full()
    else:
        is_tail = j == (n_red_tiles - 1)

        @pl.when(jnp.logical_not(is_tail))
        def _clean():
            accumulate_full()

        @pl.when(is_tail)
        def _tail():
            # Only the tail tile pays for masking.  OOB lanes of the padded
            # block may hold NaN/Inf from log(garbage); the select discards
            # them before the accumulate.  Fully out-of-bounds lane chunks are
            # skipped entirely (never loaded or computed).
            lane = jax.lax.broadcasted_iota(jnp.int32, (rows, lane_w), 1)
            part = jnp.zeros((rows, lane_w), jnp.float32)
            for k in range(n_lane_blocks):
                lo = k * lane_w
                if lo + lane_w <= rem:          # fully valid lane chunk
                    part = part + bce_chunk(k)
                elif lo < rem:                  # chunk straddling the ragged edge
                    part = part + jnp.where(lane < (rem - lo), bce_chunk(k), 0.0)
                # else: chunk entirely in the OOB padding -- skip.
            o_ref[...] += part


@functools.lru_cache(maxsize=1)
def _vmem_capacity_bytes():
    """Physical VMEM per core; conservative (v7x-sized) fallback if unknown."""
    try:
        cap = int(getattr(pltpu.get_tpu_info(), "vmem_capacity_bytes", 0) or 0)
        if cap > 0:
            return cap
    except Exception:
        pass
    return 64 * 1024 * 1024


@functools.partial(jax.jit, static_argnames=("max_tile_n",))
def bce_loss_with_weight(pred, true, weight, *, max_tile_n=8192):
    """pred, true: (B, C, *spatial) probabilities/targets; weight: length-C."""
    if pred.ndim < 2:
        raise ValueError("pred must have shape (B, C, ...)")
    if len(weight) != pred.shape[1]:
        raise ValueError("weight length does not match the class dimension")

    B, C = pred.shape[0], pred.shape[1]
    N = 1
    for d in pred.shape[2:]:
        N *= d
    R = B * C

    # Free contiguous reshapes -- no transpose, no pad, no extra HBM traffic.
    p2 = pred.reshape(R, N)
    t2 = true.reshape(R, N)

    itemsize = jnp.dtype(pred.dtype).itemsize
    t_itemsize = jnp.dtype(true.dtype).itemsize
    sublane = {4: 8, 2: 16, 1: 32}.get(itemsize, 8)

    # ---- lane (N) tile ------------------------------------------------------
    max_tile_n = max(128, (max_tile_n // 128) * 128)
    if N % 128 == 0:
        tile_n = min(max_tile_n, N)
    elif N < 128:
        tile_n = N                                   # single full-extent tile
    else:
        tile_n = min(max_tile_n, (N // 128) * 128)   # ragged tail masked in-kernel

    # ---- row (B*C) tile: target ~4 MiB per input block ----------------------
    target_block_bytes = 4 * 1024 * 1024
    rows_for_target = max(sublane, target_block_bytes // max(1, tile_n * itemsize))
    tile_r_cap = max(32 * sublane, (rows_for_target // sublane) * sublane)
    if R % sublane == 0:
        tile_r = min(R, tile_r_cap)
    elif R <= tile_r_cap:
        tile_r = R              # full extent is always a legal block dim
    else:
        tile_r = tile_r_cap     # ragged last row tile; OOB rows discarded on writeback

    # ---- generation-aware VMEM budget ---------------------------------------
    vmem_cap = _vmem_capacity_bytes()
    vmem_limit = int(min((3 * vmem_cap) // 4, 100 * 1024 * 1024))
    # Double-buffered pred+true blocks must leave headroom for the resident
    # output block, per-chunk intermediates and Mosaic internal scratch.
    input_budget = max(8 * 1024 * 1024,
                       min((3 * vmem_limit) // 5, 64 * 1024 * 1024))

    def in_flight(tr, tn):  # double-buffered pred + true blocks
        return 2 * tr * tn * (itemsize + t_itemsize)

    while in_flight(tile_r, tile_n) > input_budget:
        if tile_n >= 2048 and tile_n % 128 == 0:
            tile_n = ((tile_n // 2) // 128) * 128
        elif tile_r >= 2 * sublane and tile_r % sublane == 0:
            tile_r = ((tile_r // 2) // sublane) * sublane
        elif tile_n > 128 and tile_n % 128 == 0:
            tile_n = max(128, ((tile_n // 2) // 128) * 128)
        else:
            break

    n_red_tiles = pl.cdiv(N, tile_n)
    n_row_tiles = pl.cdiv(R, tile_r)
    rem = N - (n_red_tiles - 1) * tile_n
    need_mask = (N % tile_n) != 0
    lane_w = 128 if tile_n % 128 == 0 else tile_n
    n_lane_blocks = tile_n // lane_w

    kernel = functools.partial(
        _bce_rowsum_kernel, lane_w=lane_w, n_lane_blocks=n_lane_blocks,
        n_red_tiles=n_red_tiles, rem=rem, need_mask=need_mask)

    in_map = lambda i, j: (i, j)

    row_part = pl.pallas_call(
        kernel,
        out_shape=jax.ShapeDtypeStruct((R, lane_w), jnp.float32),
        grid_spec=pltpu.PrefetchScalarGridSpec(
            num_scalar_prefetch=0,
            grid=(n_row_tiles, n_red_tiles),
            in_specs=[
                pl.BlockSpec((tile_r, tile_n), in_map),   # pred tiles
                pl.BlockSpec((tile_r, tile_n), in_map),   # true tiles
            ],
            out_specs=pl.BlockSpec((tile_r, lane_w), lambda i, j: (i, 0)),
        ),
        compiler_params=pltpu.CompilerParams(
            dimension_semantics=("parallel", "arbitrary"),
            vmem_limit_bytes=vmem_limit),
    )(p2, t2)

    # Tiny epilogue: final 128-lane reduce + per-class weighting on (R,)/(C,).
    per_row = jnp.sum(row_part, axis=-1)              # (R,)
    per_class = per_row.reshape(B, C).sum(axis=0)     # (C,) BCE element sums
    w = jnp.asarray(weight, jnp.float32)
    return jnp.sum(w * per_class) / (jnp.sum(w) * jnp.float32(B * N))


def _reference(pred, true, weight):
    """Pure-JAX reference matching the PyTorch module semantics."""
    C = pred.shape[1]
    w = jnp.asarray(weight, jnp.float32)
    wsum = jnp.sum(w)
    loss = 0.0
    for i in range(C):
        p = pred[:, i].astype(jnp.float32)
        t = true[:, i].astype(jnp.float32)
        bce = -(t * jnp.maximum(jnp.log(p), -100.0)
                + (1.0 - t) * jnp.maximum(jnp.log(1.0 - p), -100.0))
        loss = loss + (w[i] / wsum) * jnp.mean(bce)
    return loss


if __name__ == "__main__":
    key = jax.random.PRNGKey(0)
    k1, k2 = jax.random.split(key)

    B, C, H, W = 2, 4, 16, 16
    # predictions must be probabilities in (0, 1)
    pred = jax.random.uniform(k1, (B, C, H, W), jnp.float32,
                              minval=0.01, maxval=0.99)
    true = jnp.round(jax.random.uniform(k2, (B, C, H, W), jnp.float32))
    weight = [1.0, 2.0, 3.0, 4.0]  # deterministic per-class weights, len == C

    out = bce_loss_with_weight(pred, true, weight)
    out = jax.block_until_ready(out)

    ref = _reference(pred, true, weight)
    assert jnp.allclose(out, ref, rtol=1e-5, atol=1e-5), (out, ref)

    print("KERNEL_OK")
</pallas_src>

<mosaic_0001>
module attributes {stable_mosaic.version = 11 : i64} {
  func.func @_bce_rowsum_kernel(%arg0: i32, %arg1: i32, %arg2: memref<8x256xf32, #tpu.memory_space<vmem>>, %arg3: memref<8x256xf32, #tpu.memory_space<vmem>>, %arg4: memref<8x128xf32, #tpu.memory_space<vmem>>) attributes {dimension_semantics = [#tpu.dimension_semantics<parallel>, #tpu.dimension_semantics<arbitrary>], iteration_bounds = array<i64: 1, 1>, scalar_prefetch = 0 : i64, scratch_operands = 0 : i64, tpu.core_type = #tpu.core_type<tc>, window_params = [{transform_indices = @transform_0, window_bounds = array<i64: 8, 256>}, {transform_indices = @transform_1, window_bounds = array<i64: 8, 256>}, {transform_indices = @transform_2, window_bounds = array<i64: 8, 128>}]} {
    %c0_i32 = arith.constant 0 : i32
    %0 = arith.cmpi eq, %arg1, %c0_i32 : i32
    %1 = arith.extui %0 : i1 to i32
    %c0_i32_0 = arith.constant 0 : i32
    %2 = arith.cmpi ne, %1, %c0_i32_0 : i32
    scf.if %2 {
      %cst_18 = arith.constant 0.000000e+00 : f32
      %37 = vector.broadcast %cst_18 : f32 to vector<8x128xf32>
      %c0_19 = arith.constant 0 : index
      %c0_20 = arith.constant 0 : index
      %38 = vector.load %arg4[%c0_19, %c0_20] : memref<8x128xf32, #tpu.memory_space<vmem>>, vector<8x128xf32>
      tpu.vector_store %arg4[%c0_19, %c0_20], %37 {strides = array<i32>} : memref<8x128xf32, #tpu.memory_space<vmem>>, vector<8x128xf32>,
    } else {
    }
    %c0 = arith.constant 0 : index
    %c0_1 = arith.constant 0 : index
    %3 = vector.load %arg2[%c0, %c0_1] : memref<8x256xf32, #tpu.memory_space<vmem>>, vector<8x128xf32>
    %c0_2 = arith.constant 0 : index
    %c0_3 = arith.constant 0 : index
    %4 = vector.load %arg3[%c0_2, %c0_3] : memref<8x256xf32, #tpu.memory_space<vmem>>, vector<8x128xf32>
    %5 = math.log %3 : vector<8x128xf32>
    %cst = arith.constant -1.000000e+02 : f32
    %6 = vector.broadcast %cst : f32 to vector<8x128xf32>
    %7 = arith.maximumf %5, %6 : vector<8x128xf32>
    %cst_4 = arith.constant 1.000000e+00 : f32
    %8 = vector.broadcast %cst_4 : f32 to vector<8x128xf32>
    %9 = arith.subf %8, %3 : vector<8x128xf32>
    %10 = math.log %9 : vector<8x128xf32>
    %cst_5 = arith.constant -1.000000e+02 : f32
    %11 = vector.broadcast %cst_5 : f32 to vector<8x128xf32>
    %12 = arith.maximumf %10, %11 : vector<8x128xf32>
    %13 = arith.subf %7, %12 : vector<8x128xf32>
    %14 = arith.mulf %4, %13 : vector<8x128xf32>
    %15 = arith.addf %12, %14 : vector<8x128xf32>
    %cst_6 = arith.constant 0.000000e+00 : f32
    %16 = vector.broadcast %cst_6 : f32 to vector<8x128xf32>
    %17 = arith.subf %16, %15 : vector<8x128xf32>
    %c0_7 = arith.constant 0 : index
    %c128 = arith.constant 128 : index
    %18 = vector.load %arg2[%c0_7, %c128] : memref<8x256xf32, #tpu.memory_space<vmem>>, vector<8x128xf32>
    %c0_8 = arith.constant 0 : index
    %c128_9 = arith.constant 128 : index
    %19 = vector.load %arg3[%c0_8, %c128_9] : memref<8x256xf32, #tpu.memory_space<vmem>>, vector<8x128xf32>
    %20 = math.log %18 : vector<8x128xf32>
    %cst_10 = arith.constant -1.000000e+02 : f32
    %21 = vector.broadcast %cst_10 : f32 to vector<8x128xf32>
    %22 = arith.maximumf %20, %21 : vector<8x128xf32>
    %cst_11 = arith.constant 1.000000e+00 : f32
    %23 = vector.broadcast %cst_11 : f32 to vector<8x128xf32>
    %24 = arith.subf %23, %18 : vector<8x128xf32>
    %25 = math.log %24 : vector<8x128xf32>
    %cst_12 = arith.constant -1.000000e+02 : f32
    %26 = vector.broadcast %cst_12 : f32 to vector<8x128xf32>
    %27 = arith.maximumf %25, %26 : vector<8x128xf32>
    %28 = arith.subf %22, %27 : vector<8x128xf32>
    %29 = arith.mulf %19, %28 : vector<8x128xf32>
    %30 = arith.addf %27, %29 : vector<8x128xf32>
    %cst_13 = arith.constant 0.000000e+00 : f32
    %31 = vector.broadcast %cst_13 : f32 to vector<8x128xf32>
    %32 = arith.subf %31, %30 : vector<8x128xf32>
    %33 = arith.addf %17, %32 : vector<8x128xf32>
    %c0_14 = arith.constant 0 : index
    %c0_15 = arith.constant 0 : index
    %34 = vector.load %arg4[%c0_14, %c0_15] : memref<8x128xf32, #tpu.memory_space<vmem>>, vector<8x128xf32>
    %35 = arith.addf %34, %33 : vector<8x128xf32>
    %c0_16 = arith.constant 0 : index
    %c0_17 = arith.constant 0 : index
    %36 = vector.load %arg4[%c0_16, %c0_17] : memref<8x128xf32, #tpu.memory_space<vmem>>, vector<8x128xf32>
    tpu.vector_store %arg4[%c0_16, %c0_17], %35 {strides = array<i32>} : memref<8x128xf32, #tpu.memory_space<vmem>>, vector<8x128xf32>,
    return
  }
  func.func @transform_0(%arg0: i32, %arg1: i32) -> (i32, i32) {
    %c0_i32 = arith.constant 0 : i32
    return %arg0, %arg1 : i32, i32
  }
  func.func @transform_1(%arg0: i32, %arg1: i32) -> (i32, i32) {
    %c0_i32 = arith.constant 0 : i32
    return %arg0, %arg1 : i32, i32
  }
  func.func @transform_2(%arg0: i32, %arg1: i32) -> (i32, i32) {
    %c0_i32 = arith.constant 0 : i32
    %c0_i32_0 = arith.constant 0 : i32
    return %arg0, %c0_i32 : i32, i32
  }
}

</mosaic_0001>

<bundles_post_ra>
// kernel: bce_loss_with_weight.1
= control target key start
LH: loop header
LB: loop body
LE: loop exit
PB: predicated region body
PF: predicated region fallthrough
CT: control target
= control target key end

     0   :  { %s89_s0 = inlined_call_operand.vmem [shape: f32[8,256], index: 0, kind: input, shape index: {}]   ;;  %s90_s1 = inlined_call_operand.vmem [shape: f32[8,256], index: 1, kind: input, shape index: {}]   ;;  %s91_s2 = inlined_call_operand.vmem [shape: f32[8,128], index: 2, kind: output, shape index: {}]  }
   0x1   :  { %v16_v0 = vld [vmem:[%s89_s0] sm:$0xff]  ;;  %v29_v1 = vld [vmem:[%s89_s0 + $0x8] sm:$0xff] }
   0x2   :  { %51 = vlog2.f32 %v16_v0  ;;  %v21_v2 = vsub.f32 1.0, %v16_v0  ;;  %v34_v3 = vsub.f32 1.0, %v29_v1  ;;  %v17_v15 = vld [vmem:[%s90_s1] sm:$0xff]  ;;  %v30_v18 = vld [vmem:[%s90_s1 + $0x8] sm:$0xff] }
   0x3   :  { %53 = vlog2.f32 %v29_v1 }
   0x4   :  { %55 = vlog2.f32 %v21_v2 }
   0x5   :  { %57 = vlog2.f32 %v34_v3 }
   0xc   :  { %v52_v4 = vpop.eup %51 }
   0xd   :  { %v54_v5 = vpop.eup %53  ;;  %v19_v6 = vmul.f32 0.6931472, %v52_v4 }
   0xe   :  { %v56_v7 = vpop.eup %55  ;;  %v32_v8 = vmul.f32 0.6931472, %v54_v5 }
   0xf   :  { %v58_v9 = vpop.eup %57  ;;  %v20_v10 = vmax.f32 %v19_v6, -100.0  ;;  %v23_v11 = vmul.f32 0.6931472, %v56_v7 }
  0x10   :  { %v33_v12 = vmax.f32 %v32_v8, -100.0  ;;  %v36_v13 = vmul.f32 0.6931472, %v58_v9 }
  0x11   :  { %v24_v14 = vmax.f32 %v23_v11, -100.0 }
  0x12   :  { %v37_v16 = vmax.f32 %v36_v13, -100.0 }
  0x13   :  { %v25_v17 = vsub.f32 %v20_v10, %v24_v14 }
  0x14   :  { %v38_v19 = vsub.f32 %v33_v12, %v37_v16 }
  0x15   :  { %v26_v20 = vmul.f32 %v25_v17, %v17_v15 }
  0x16   :  { %v39_v21 = vmul.f32 %v38_v19, %v30_v18 }
  0x17   :  { %v27_v22 = vadd.f32 %v26_v20, %v24_v14 }
  0x18   :  { %v40_v23 = vadd.f32 %v39_v21, %v37_v16 }
  0x19   :  { %v28_v24 = vsub.f32 0.0, %v27_v22 }
  0x1a   :  { %v41_v25 = vsub.f32 0.0, %v40_v23 }
  0x1c   :  { %v42_v26 = vadd.f32 %v41_v25, %v28_v24 }
  0x1e   :  { %45 = vst [vmem:[%s91_s2] sm:$0xff] %v42_v26 }

</bundles_post_ra>
